<compile_context>
chip_gen: v7x
topology: tpu7x:2x2x1
jax: 0.10.0
libtpu: 0.0.40
codegen_flags: <defaults>
</compile_context>

<pallas_src>
import functools

import jax
import jax.numpy as jnp
from jax.experimental import pallas as pl
from jax.experimental.pallas import tpu as pltpu


def _round_up(x, m):
    return ((x + m - 1) // m) * m


def _neg_sampling_loss_kernel(inp_ref, out_ref, noise_ref, partial_ref, *,
                              total_b, block_b, n_noise, need_mask):
    pid = pl.program_id(0)

    inp = inp_ref[...]            # (Bblk, E)      native dtype
    outv = out_ref[...]           # (Bblk, E)      native dtype
    noise = noise_ref[...]        # (Bblk*N, E)    native dtype, dense sublanes

    # Positive term: softplus(-<out_b, in_b>)  == -log(sigmoid(<out_b, in_b>))
    pos = jnp.sum(outv * inp, axis=-1, keepdims=True, dtype=jnp.float32)   # (Bblk, 1)
    pos_term = jax.nn.softplus(-pos)                                       # (Bblk, 1)

    # Negative terms, flat over (b, n): softplus(<noise_bn, in_b>)
    # (sign folded: log(sigmoid(<-noise, in>)) == -softplus(<noise, in>))
    # inp repeated N times along the sublane axis (hoisted once per block) so the
    # dominant multiply over the flat noise tile stays sublane-dense.
    inp_rep = jnp.repeat(inp, n_noise, axis=0)                             # (Bblk*N, E)
    s = jnp.sum(noise * inp_rep, axis=-1, keepdims=True, dtype=jnp.float32)
    neg_term = jax.nn.softplus(s)                                          # (Bblk*N, 1)

    def _write(value):
        # Lane-dense (1, 8, 128) output tile -> full unmasked store; wrapper
        # reads element [i, 0, 0].
        partial_ref[...] = jnp.full(partial_ref.shape, value, dtype=jnp.float32)

    if need_mask:
        last = pl.num_programs(0) - 1

        @pl.when(pid != last)
        def _():
            _write(jnp.sum(pos_term) + jnp.sum(neg_term))

        @pl.when(pid == last)
        def _():
            # Only the last block is partial: drop contributions from padded rows.
            row = pid * block_b + jax.lax.broadcasted_iota(
                jnp.int32, (block_b, 1), 0)
            p = jnp.where(row < total_b, pos_term, 0.0)
            frow = pid * (block_b * n_noise) + jax.lax.broadcasted_iota(
                jnp.int32, (block_b * n_noise, 1), 0)
            q = jnp.where(frow < total_b * n_noise, neg_term, 0.0)
            _write(jnp.sum(p) + jnp.sum(q))
    else:
        _write(jnp.sum(pos_term) + jnp.sum(neg_term))


def negative_sampling_loss(input_vectors, output_vectors, noise_vectors,
                           *, block_b=None):
    """input_vectors (B,E), output_vectors (B,E), noise_vectors (B,N,E) -> scalar f32."""
    B, E = input_vectors.shape
    Bn, N, En = noise_vectors.shape
    assert (Bn, En) == (B, E) and output_vectors.shape == (B, E)

    itemsize = jnp.dtype(input_vectors.dtype).itemsize
    e_pad = _round_up(E, 128)

    # Per-generation VMEM budget. v4/v5/v6 TensorCores have 128 MiB VMEM; v7x
    # (and anything unknown) is treated conservatively (64 MiB per TC).
    try:
        kind = jax.devices()[0].device_kind.lower()
    except Exception:  # pragma: no cover - defensive
        kind = ""
    big_vmem = any(t in kind for t in ("v4", "v5", "v6"))
    if big_vmem:
        vmem_budget = 80 * 2**20      # pipeline buffers (x2) + compute temporaries
        vmem_limit = 100 * 2**20
        min_blocks = 2                # keep DMA/compute overlap
    else:
        vmem_budget = 36 * 2**20
        vmem_limit = 48 * 2**20
        min_blocks = 4                # megacore: 2 TCs, >=2 overlapped steps each

    if block_b is None:
        # Padding-aware per-batch-row footprint:
        #   double-buffered pipeline tiles (inp, out, flat noise) in the input dtype
        #   + ~2 noise-tile-sized f32 compute temporaries (repeated inp, f32 accum).
        per_row_pipe = 2 * (2 * e_pad + N * e_pad) * itemsize
        per_row_temp = 2 * N * e_pad * 4
        per_row = per_row_pipe + per_row_temp
        block_b = max(8, min(B, vmem_budget // per_row))
        # Cap so there are >= min_blocks grid steps whenever B allows it.
        cap = _round_up(pl.cdiv(B, min_blocks), 8)
        block_b = min(block_b, max(8, cap))
        if block_b < B:
            block_b = max(8, (block_b // 8) * 8)   # keep sublane dim a multiple of 8
        # Fail loudly instead of hitting a Mosaic VMEM OOM when a minimal tile
        # (8 rows, double-buffered) already cannot fit.
        if 8 * per_row_pipe > vmem_limit:
            raise ValueError(
                "negative_sampling_loss: a single 8-row tile "
                f"({8 * per_row_pipe} bytes double-buffered) exceeds the VMEM "
                f"limit ({vmem_limit} bytes); N*E is too large for this kernel.")
    block_b = min(block_b, B)

    num_blocks = pl.cdiv(B, block_b)
    need_mask = (B % block_b) != 0

    # Free, contiguous reshape: the (B, N, E) row-major layout is already (B*N, E).
    noise_flat = noise_vectors.reshape(B * N, E)

    kernel = functools.partial(
        _neg_sampling_loss_kernel,
        total_b=B, block_b=block_b, n_noise=N, need_mask=need_mask)

    cost = pl.CostEstimate(
        flops=2 * B * (N + 1) * E,
        transcendentals=2 * B * (N + 1),
        bytes_accessed=B * (N + 2) * E * itemsize + num_blocks * 8 * 128 * 4,
    )

    partials = pl.pallas_call(
        kernel,
        out_shape=jax.ShapeDtypeStruct((num_blocks, 8, 128), jnp.float32),
        grid=(num_blocks,),
        in_specs=[
            pl.BlockSpec((block_b, E), lambda i: (i, 0)),
            pl.BlockSpec((block_b, E), lambda i: (i, 0)),
            pl.BlockSpec((block_b * N, E), lambda i: (i, 0)),
        ],
        out_specs=pl.BlockSpec((1, 8, 128), lambda i: (i, 0, 0)),
        compiler_params=pltpu.CompilerParams(
            dimension_semantics=("parallel",),   # megacore shards the batch grid
            vmem_limit_bytes=vmem_limit,
        ),
        cost_estimate=cost,
    )(input_vectors, output_vectors, noise_flat)

    # loss = -mean(out_loss + noise_loss) == sum(per-block softplus sums) / global B
    return jnp.sum(partials[:, 0, 0]) / B


if __name__ == "__main__":
    key = jax.random.PRNGKey(0)
    k1, k2, k3 = jax.random.split(key, 3)

    B, E, N = 8, 32, 4   # batch, embed_size, n_negative_samples
    input_vectors = jax.random.normal(k1, (B, E), dtype=jnp.float32)
    output_vectors = jax.random.normal(k2, (B, E), dtype=jnp.float32)
    noise_vectors = jax.random.normal(k3, (B, N, E), dtype=jnp.float32)

    loss = negative_sampling_loss(input_vectors, output_vectors, noise_vectors)
    loss = jax.block_until_ready(loss)

    # Pure-JAX reference mirroring the PyTorch forward exactly.
    pos = jnp.sum(output_vectors * input_vectors, axis=-1)
    out_loss_ref = jnp.log(jax.nn.sigmoid(pos))
    neg = jnp.einsum("bne,be->bn", -noise_vectors, input_vectors)
    noise_loss_ref = jnp.sum(jnp.log(jax.nn.sigmoid(neg)), axis=-1)
    ref = -jnp.mean(out_loss_ref + noise_loss_ref)

    assert jnp.allclose(loss, ref, rtol=1e-5, atol=1e-5), (loss, ref)
    print("KERNEL_OK")
</pallas_src>

<mosaic_0001>
module attributes {stable_mosaic.version = 11 : i64} {
  func.func @_neg_sampling_loss_kernel(%arg0: i32, %arg1: memref<8x32xf32, #tpu.memory_space<vmem>>, %arg2: memref<8x32xf32, #tpu.memory_space<vmem>>, %arg3: memref<32x32xf32, #tpu.memory_space<vmem>>, %arg4: memref<1x8x128xf32, #tpu.memory_space<vmem>>) attributes {dimension_semantics = [#tpu.dimension_semantics<parallel>], iteration_bounds = array<i64: 1>, scalar_prefetch = 0 : i64, scratch_operands = 0 : i64, tpu.core_type = #tpu.core_type<tc>, window_params = [{transform_indices = @transform_0, window_bounds = array<i64: 8, 32>}, {transform_indices = @transform_1, window_bounds = array<i64: 8, 32>}, {transform_indices = @transform_2, window_bounds = array<i64: 32, 32>}, {transform_indices = @transform_3, window_bounds = array<i64: 1, 8, 128>}]} {
    %c0 = arith.constant 0 : index
    %c0_0 = arith.constant 0 : index
    %0 = vector.load %arg1[%c0, %c0_0] : memref<8x32xf32, #tpu.memory_space<vmem>>, vector<8x32xf32>
    %c0_1 = arith.constant 0 : index
    %c0_2 = arith.constant 0 : index
    %1 = vector.load %arg2[%c0_1, %c0_2] : memref<8x32xf32, #tpu.memory_space<vmem>>, vector<8x32xf32>
    %c0_3 = arith.constant 0 : index
    %c0_4 = arith.constant 0 : index
    %2 = vector.load %arg3[%c0_3, %c0_4] : memref<32x32xf32, #tpu.memory_space<vmem>>, vector<32x32xf32>
    %3 = arith.mulf %1, %0 : vector<8x32xf32>
    %cst = arith.constant dense<0.000000e+00> : vector<8xf32>
    %4 = vector.multi_reduction <add>, %3, %cst [1] : vector<8x32xf32> to vector<8xf32>
    %5 = vector.shape_cast %4 : vector<8xf32> to vector<8x1xf32>
    %cst_5 = arith.constant 0.000000e+00 : f32
    %6 = vector.broadcast %cst_5 : f32 to vector<8x1xf32>
    %7 = arith.subf %6, %5 : vector<8x1xf32>
    %cst_6 = arith.constant 0.000000e+00 : f32
    %8 = vector.broadcast %cst_6 : f32 to vector<8x1xf32>
    %9 = arith.maximumf %7, %8 : vector<8x1xf32>
    %10 = vector.broadcast %cst_6 : f32 to vector<8x1xf32>
    %11 = arith.subf %7, %10 : vector<8x1xf32>
    %12 = arith.cmpf one, %11, %11 : vector<8x1xf32>
    %13 = vector.broadcast %cst_6 : f32 to vector<8x1xf32>
    %14 = arith.addf %7, %13 : vector<8x1xf32>
    %15 = math.absf %11 : vector<8x1xf32>
    %cst_7 = arith.constant 0.000000e+00 : f32
    %16 = vector.broadcast %cst_7 : f32 to vector<8x1xf32>
    %17 = arith.subf %16, %15 : vector<8x1xf32>
    %18 = math.exp %17 : vector<8x1xf32>
    %19 = math.log1p %18 : vector<8x1xf32>
    %20 = arith.addf %9, %19 : vector<8x1xf32>
    %21 = arith.select %12, %14, %20 : vector<8x1xi1>, vector<8x1xf32>
    %22 = vector.shape_cast %0 : vector<8x32xf32> to vector<8x1x32xf32>
    %23 = vector.broadcast %22 : vector<8x1x32xf32> to vector<8x4x32xf32>
    %24 = vector.shape_cast %23 : vector<8x4x32xf32> to vector<32x32xf32>
    %25 = arith.mulf %2, %24 : vector<32x32xf32>
    %cst_8 = arith.constant dense<0.000000e+00> : vector<32xf32>
    %26 = vector.multi_reduction <add>, %25, %cst_8 [1] : vector<32x32xf32> to vector<32xf32>
    %27 = vector.shape_cast %26 : vector<32xf32> to vector<32x1xf32>
    %cst_9 = arith.constant 0.000000e+00 : f32
    %28 = vector.broadcast %cst_9 : f32 to vector<32x1xf32>
    %29 = arith.maximumf %27, %28 : vector<32x1xf32>
    %30 = vector.broadcast %cst_9 : f32 to vector<32x1xf32>
    %31 = arith.subf %27, %30 : vector<32x1xf32>
    %32 = arith.cmpf one, %31, %31 : vector<32x1xf32>
    %33 = vector.broadcast %cst_9 : f32 to vector<32x1xf32>
    %34 = arith.addf %27, %33 : vector<32x1xf32>
    %35 = math.absf %31 : vector<32x1xf32>
    %cst_10 = arith.constant 0.000000e+00 : f32
    %36 = vector.broadcast %cst_10 : f32 to vector<32x1xf32>
    %37 = arith.subf %36, %35 : vector<32x1xf32>
    %38 = math.exp %37 : vector<32x1xf32>
    %39 = math.log1p %38 : vector<32x1xf32>
    %40 = arith.addf %29, %39 : vector<32x1xf32>
    %41 = arith.select %32, %34, %40 : vector<32x1xi1>, vector<32x1xf32>
    %42 = vector.shape_cast %21 : vector<8x1xf32> to vector<1x8x1xf32>
    %cst_11 = arith.constant dense<0.000000e+00> : vector<1xf32>
    %43 = vector.multi_reduction <add>, %42, %cst_11 [1, 2] : vector<1x8x1xf32> to vector<1xf32>
    %44 = vector.shape_cast %43 : vector<1xf32> to vector<1x1x1xf32>
    %45 = vector.extract %44[0, 0, 0] : f32 from vector<1x1x1xf32>
    %46 = vector.shape_cast %41 : vector<32x1xf32> to vector<1x32x1xf32>
    %cst_12 = arith.constant dense<0.000000e+00> : vector<1xf32>
    %47 = vector.multi_reduction <add>, %46, %cst_12 [1, 2] : vector<1x32x1xf32> to vector<1xf32>
    %48 = vector.shape_cast %47 : vector<1xf32> to vector<1x1x1xf32>
    %49 = vector.extract %48[0, 0, 0] : f32 from vector<1x1x1xf32>
    %50 = arith.addf %45, %49 : f32
    %51 = vector.broadcast %50 : f32 to vector<1x8x128xf32>
    %c0_13 = arith.constant 0 : index
    %c0_14 = arith.constant 0 : index
    %c0_15 = arith.constant 0 : index
    %52 = vector.load %arg4[%c0_13, %c0_14, %c0_15] : memref<1x8x128xf32, #tpu.memory_space<vmem>>, vector<1x8x128xf32>
    tpu.vector_store %arg4[%c0_13, %c0_14, %c0_15], %51 {strides = array<i32>} : memref<1x8x128xf32, #tpu.memory_space<vmem>>, vector<1x8x128xf32>,
    return
  }
  func.func @transform_0(%arg0: i32) -> (i32, i32) {
    %c0_i32 = arith.constant 0 : i32
    %c0_i32_0 = arith.constant 0 : i32
    return %arg0, %c0_i32 : i32, i32
  }
  func.func @transform_1(%arg0: i32) -> (i32, i32) {
    %c0_i32 = arith.constant 0 : i32
    %c0_i32_0 = arith.constant 0 : i32
    return %arg0, %c0_i32 : i32, i32
  }
  func.func @transform_2(%arg0: i32) -> (i32, i32) {
    %c0_i32 = arith.constant 0 : i32
    %c0_i32_0 = arith.constant 0 : i32
    return %arg0, %c0_i32 : i32, i32
  }
  func.func @transform_3(%arg0: i32) -> (i32, i32, i32) {
    %c0_i32 = arith.constant 0 : i32
    %c0_i32_0 = arith.constant 0 : i32
    %c0_i32_1 = arith.constant 0 : i32
    return %arg0, %c0_i32, %c0_i32_0 : i32, i32, i32
  }
}

</mosaic_0001>

<bundles_post_ra>
// kernel: tpu_custom_call.1
= control target key start
LH: loop header
LB: loop body
LE: loop exit
PB: predicated region body
PF: predicated region fallthrough
CT: control target
= control target key end

     0   :  { %8 = vsyncpa [#allocation3], 0  ;;  %s558_s0 = inlined_call_operand.hbm [shape: f32[8,32], index: 0, kind: input, shape index: {}]   ;;  %s559_s1 = inlined_call_operand.hbm [shape: f32[8,32], index: 1, kind: input, shape index: {}]   ;;  %s560_s2 = inlined_call_operand.hbm [shape: f32[32,32], index: 2, kind: input, shape index: {}]   ;;  %s561_s3 = inlined_call_operand.hbm [shape: f32[1,8,128], index: 3, kind: output, shape index: {}]  }
   0x1   :  { %9 = vsyncpa [#allocation6], 0 }
   0x2   :  { %10 = vsyncpa [#allocation4], 0  ;;  %s432_s12 = smov [#allocation5]   ;;  %s433_s14 = smov [#allocation2]  }
   0x3   :  { %s27_s13 = sshll.u32 %s432_s12, 4  ;;  %s17_s15 = sshll.u32 %s433_s14, 4  ;;  %s28_s13 = int_to_ptr.vmem [resolvable:$true] %s27_s13  ;;  %s18_s15 = int_to_ptr.vmem [resolvable:$true] %s17_s15 }
   0x4   :  { %s338_s18 = scalar_lea.hbm %s559_s1, 128 }
   0x5   :  { %p339_p0 = scmp.ne.s32.totalorder %s559_s1, %s338_s18  ;;  %p342_p1 = scmp.lt.u32.totalorder %s338_s18, %s559_s1 }
   0x7   :  { %p344_p2 = pnand %p342_p1, %p339_p0 }
   0x9   :  { %347 = shalt.err (!%p344_p2)
}
   0xa   :  { %s348_s23 = scalar_lea.vmem %s28_s13, 128  ;;  %p353_p4 = scmp.lt.s32.totalorder %s28_s13, %s28_s13 }
   0xb   :  { %p349_p3 = scmp.ne.s32.totalorder %s28_s13, %s348_s23  ;;  %p354_p5 = scmp.lt.s32.totalorder %s348_s23, %s348_s23 }
   0xd   :  { %p355_p6 = por %p354_p5, %p353_p4 }
   0xf   :  { %p356_p7 = pnand %p355_p6, %p349_p3 }
  0x11   :  { %359 = shalt.err (!%p356_p7)
}
  0x12   :  { %30 = dma.hbm_to_vmem [thread:$0]  %s559_s1, 128, %s28_s13, [#allocation6]  }
  0x13   :  { %s360_s28 = scalar_lea.hbm %s558_s0, 128 }
  0x14   :  { %p361_p8 = scmp.ne.s32.totalorder %s558_s0, %s360_s28  ;;  %p364_p9 = scmp.lt.u32.totalorder %s360_s28, %s558_s0 }
  0x16   :  { %p366_p10 = pnand %p364_p9, %p361_p8 }
  0x18   :  { %369 = shalt.err (!%p366_p10)
}
  0x19   :  { %s370_s6 = scalar_lea.vmem %s18_s15, 128  ;;  %p375_p12 = scmp.lt.s32.totalorder %s18_s15, %s18_s15 }
  0x1a   :  { %p371_p11 = scmp.ne.s32.totalorder %s18_s15, %s370_s6  ;;  %p376_p13 = scmp.lt.s32.totalorder %s370_s6, %s370_s6 }
  0x1c   :  { %p377_p0 = por %p376_p13, %p375_p12 }
  0x1e   :  { %p378_p1 = pnand %p377_p0, %p371_p11 }
  0x20   :  { %381 = shalt.err (!%p378_p1)
}
  0x21   :  { %20 = dma.hbm_to_vmem [thread:$0]  %s558_s0, 128, %s18_s15, [#allocation3]  }
  0x22   :  { %s434_s8 = smov [#allocation7]   ;;  %s382_s12 = scalar_lea.hbm %s560_s2, 512 }
  0x23   :  { %s36_s9 = sshll.u32 %s434_s8, 4  ;;  %p383_p2 = scmp.ne.s32.totalorder %s560_s2, %s382_s12  ;;  %s37_s9 = int_to_ptr.vmem [resolvable:$true] %s36_s9 }
  0x24   :  { %p386_p3 = scmp.lt.u32.totalorder %s382_s12, %s560_s2 }
  0x26   :  { %p388_p4 = pnand %p386_p3, %p383_p2 }
  0x28   :  { %391 = shalt.err (!%p388_p4)
}
  0x29   :  { %s392_s18 = scalar_lea.vmem %s37_s9, 512  ;;  %p397_p6 = scmp.lt.s32.totalorder %s37_s9, %s37_s9 }
  0x2a   :  { %p393_p5 = scmp.ne.s32.totalorder %s37_s9, %s392_s18  ;;  %p398_p7 = scmp.lt.s32.totalorder %s392_s18, %s392_s18 }
  0x2c   :  { %p399_p8 = por %p398_p7, %p397_p6 }
  0x2e   :  { %p400_p9 = pnand %p399_p8, %p393_p5 }
  0x30   :  { %403 = shalt.err (!%p400_p9)
}
  0x31   :  { %s435_s0 = smov 128   ;;  %s436_s15 = smov 8  }
  0x32   :  { %42 = dma.hbm_to_vmem [thread:$0]  %s560_s2, 512, %s37_s9, [#allocation6], %s435_s0, %s435_s0, %s436_s15  }
  0x33   :  { %426 = dma.done.wait [#allocation3], 128  }
  0x34   :  { %427 = vsyncadd [#allocation3], 4294967168 }
  0x35   :  { %428 = dma.done.wait [#allocation6], 640  }
  0x36   :  { %429 = vsyncadd [#allocation6], 4294966656  ;;  %v87_v0 = vlaneseq  ;;  %v437_v1 = vmov 1966171168   ;;  %v52_v6 = vld [vmem:[#allocation2] sm:$0xff]  ;;  %v54_v22 = vld [vmem:[#allocation7] sm:$0xff] }
  0x37   :  { %v85_v2 = vunpack.c.l.s4 %v437_v1  ;;  %v83_v9 = vcombine.high %v52_v6, %v52_v6  ;;  %v53_v28 = vld [vmem:[#allocation5] sm:$0xff]  ;;  %vm59_vm0 = vcmask 261120   ;;  %v56_v30 = vld [vmem:[#allocation7 + $0x10] sm:$0xff]  ;;  %v55_v31 = vld [vmem:[#allocation7 + $0x8] sm:$0xff]  ;;  %vm260_vm4 = vcmask 7168   ;;  %s438_s21 = smov [#allocation8]  }
  0x38   :  { %v88_v3 = vshrl.u32 %v87_v0, 7  ;;  %v58_v37 = vmul.f32 %v53_v28, %v52_v6  ;;  %v57_v38 = vld [vmem:[#allocation7 + $0x18] sm:$0xff]  ;;  %s296_s22 = sshll.u32 %s438_s21, 4  ;;  %s297_s22 = int_to_ptr.vmem [resolvable:$true] %s296_s22 }
  0x39   :  { %v86_v4 = vunpack.c.0.s8 %v85_v2  ;;  %s404_s25 = scalar_lea.vmem %s297_s22, 128  ;;  %p409_p11 = scmp.lt.s32.totalorder %s297_s22, %s297_s22 }
  0x3a   :  { %v134_v8 = vsub.s32 0, %v88_v3  ;;  %v60_v46 = vsel %vm59_vm0, %v58_v37, 0.0  ;;  %p405_p10 = scmp.ne.s32.totalorder %s297_s22, %s404_s25  ;;  %p410_p12 = scmp.lt.s32.totalorder %s404_s25, %s404_s25 }
  0x3b   :  { %v89_v5 = vsub.s32 %v86_v4, %v88_v3 }
  0x3c   :  { %p411_p13 = por %p410_p12, %p409_p11 }
  0x3d   :  { %v90_v7 = vrot.slane %v52_v6, %v89_v5  ;;  %v97_v12 = vrot.slane %v83_v9, %v89_v5 }
  0x3e   :  { %p412_p0 = pnand %p411_p13, %p405_p10 }
  0x3f   :  { %v98_v10 = vcombine.high %v90_v7, %v90_v7  ;;  %v106_v11 = vrot.slane %v90_v7, %v89_v5  ;;  %v99_v15 = vcombine.high %v97_v12, %v97_v12  ;;  %v113_v16 = vrot.slane %v97_v12, %v89_v5 }
  0x41   :  { %v120_v13 = vrot.slane %v98_v10, %v89_v5  ;;  %v135_v14 = vrot.slane %v106_v11, %v134_v8  ;;  %v128_v17 = vcombine.high %v106_v11, %v106_v11  ;;  %v127_v19 = vrot.slane %v99_v15, %v89_v5 }
  0x42   :  { %v151_v20 = vrot.slane %v113_v16, %v134_v8  ;;  %v129_v24 = vcombine.high %v113_v16, %v113_v16 }
  0x43   :  { %v139_v18 = vrot.slane %v120_v13, %v134_v8  ;;  %v130_v21 = vcombine.high %v120_v13, %v120_v13  ;;  %v143_v23 = vrot.slane %v128_v17, %v134_v8  ;;  %v155_v26 = vrot.slane %v127_v19, %v134_v8 }
  0x44   :  { %v131_v29 = vcombine.high %v127_v19, %v127_v19  ;;  %v159_v32 = vrot.slane %v129_v24, %v134_v8 }
  0x45   :  { %v164_v25 = vcombine.low %v135_v14, %v139_v18  ;;  %v147_v27 = vrot.slane %v130_v21, %v134_v8  ;;  %v166_v34 = vcombine.low %v151_v20, %v155_v26 }
  0x46   :  { %v163_v36 = vrot.slane %v131_v29, %v134_v8 }
  0x47   :  { %v172_v33 = vmul.f32 %v164_v25, %v54_v22  ;;  %v165_v35 = vcombine.low %v143_v23, %v147_v27  ;;  %v174_v40 = vmul.f32 %v166_v34, %v56_v30 }
  0x48   :  { %v167_v42 = vcombine.low %v159_v32, %v163_v36 }
  0x49   :  { %v176_v39 = vsel %vm59_vm0, %v172_v33, 0.0  ;;  %v173_v41 = vmul.f32 %v165_v35, %v55_v31  ;;  %v182_v43 = vsel %vm59_vm0, %v174_v40, 0.0 }
  0x4a   :  { %177 = vadd.xlane.f32.xlu0 %v176_v39  ;;  %v175_v45 = vmul.f32 %v167_v42, %v57_v38  ;;  %183 = vadd.xlane.f32.xlu1 %v182_v43 }
  0x4b   :  { %v179_v44 = vsel %vm59_vm0, %v173_v41, 0.0 }
  0x4c   :  { %v185_v47 = vsel %vm59_vm0, %v175_v45, 0.0 }
  0x4e   :  { %180 = vadd.xlane.f32.xlu0 %v179_v44  ;;  %61 = vadd.xlane.f32.xlu1 %v60_v46 }
  0x52   :  { %186 = vadd.xlane.f32.xlu0 %v185_v47 }
  0xd7   :  { %v500_v48 = vpop.xlane.xlu0 %177  ;;  %v503_v50 = vpop.xlane.xlu1 %183 }
  0xd8   :  { %v200_v49 = vand.u32 2147483647, %v500_v48  ;;  %v202_v52 = vand.u32 2147483647, %v503_v50  ;;  %v188_v27 = vmax.f32 %v500_v48, 0.0  ;;  %vm192_vm2 = vcmp.ne.f32.partialorder %v500_v48, %v500_v48 }
  0xd9   :  { %v190_v36 = vmax.f32 %v503_v50, 0.0  ;;  %vm194_vm6 = vcmp.ne.f32.partialorder %v503_v50, %v503_v50 }
  0xda   :  { %v204_v51 = vsub.f32 0.0, %v200_v49  ;;  %v206_v55 = vsub.f32 0.0, %v202_v52 }
  0xdb   :  { %v506_v53 = vpop.xlane.xlu0 %180  ;;  %v62_v57 = vpop.xlane.xlu1 %61 }
  0xdc   :  { %v208_v54 = vmul.f32 1.442695, %v204_v51  ;;  %v201_v56 = vand.u32 2147483647, %v506_v53  ;;  %v212_v58 = vmul.f32 1.442695, %v206_v55  ;;  %vm193_vm7 = vcmp.ne.f32.partialorder %v506_v53, %v506_v53 }
  0xdd   :  { %v509_v59 = vsub.f32 0.0, %v62_v57  ;;  %v189_v44 = vmax.f32 %v506_v53, 0.0 }
  0xde   :  { %318 = vpow2.f32 %v208_v54  ;;  %v205_v60 = vsub.f32 0.0, %v201_v56 }
  0xdf   :  { %v511_v61 = vpop.xlane.xlu0 %186  ;;  %320 = vpow2.f32 %v212_v58  ;;  %v67_v62 = vand.u32 2147483647, %v509_v59  ;;  %vm65_vm10 = vcmp.ne.f32.partialorder %v509_v59, %v509_v59 }
  0xe0   :  { %v203_v63 = vand.u32 2147483647, %v511_v61  ;;  %v210_v0 = vmul.f32 1.442695, %v205_v60  ;;  %v191_v49 = vmax.f32 %v511_v61, 0.0  ;;  %v64_v60 = vmax.f32 %v509_v59, 0.0 }
  0xe1   :  { %v68_v1 = vsub.f32 0.0, %v67_v62  ;;  %vm195_vm11 = vcmp.ne.f32.partialorder %v511_v61, %v511_v61 }
  0xe2   :  { %v207_v2 = vsub.f32 0.0, %v203_v63  ;;  %322 = vpow2.f32 %v210_v0 }
  0xe3   :  { %v69_v3 = vmul.f32 1.442695, %v68_v1 }
  0xe4   :  { %v214_v4 = vmul.f32 1.442695, %v207_v2 }
  0xe5   :  { %324 = vpow2.f32 %v69_v3 }
  0xe6   :  { %326 = vpow2.f32 %v214_v4 }
  0xe8   :  { %v319_v5 = vpop.eup %318 }
  0xe9   :  { %v216_v6 = vadd.f32 1.0, %v319_v5  ;;  %v321_v7 = vpop.eup %320  ;;  %v219_v10 = vmul.f32 -0.5, %v319_v5  ;;  %v222_v18 = vand.u32 2147483647, %v319_v5 }
  0xea   :  { %v234_v8 = vadd.f32 1.0, %v321_v7  ;;  %v237_v13 = vmul.f32 -0.5, %v321_v7  ;;  %v240_v22 = vand.u32 2147483647, %v321_v7 }
  0xeb   :  { %328 = vlog2.f32 %v216_v6  ;;  %v220_v16 = vadd.f32 1.0, %v219_v10  ;;  %vm223_vm1 = vcmp.lt.f32.partialorder %v222_v18, 0.0004427343 }
  0xec   :  { %v323_v9 = vpop.eup %322  ;;  %330 = vlog2.f32 %v234_v8  ;;  %v238_v20 = vadd.f32 1.0, %v237_v13  ;;  %vm241_vm3 = vcmp.lt.f32.partialorder %v240_v22, 0.0004427343 }
  0xed   :  { %v225_v11 = vadd.f32 1.0, %v323_v9  ;;  %v228_v19 = vmul.f32 -0.5, %v323_v9  ;;  %v221_v24 = vmul.f32 %v319_v5, %v220_v16  ;;  %v231_v33 = vand.u32 2147483647, %v323_v9 }
  0xee   :  { %v239_v32 = vmul.f32 %v321_v7, %v238_v20 }
  0xef   :  { %v325_v12 = vpop.eup %324  ;;  %332 = vlog2.f32 %v225_v11  ;;  %v229_v28 = vadd.f32 1.0, %v228_v19  ;;  %vm232_vm5 = vcmp.lt.f32.partialorder %v231_v33, 0.0004427343 }
  0xf0   :  { %v327_v14 = vpop.eup %326  ;;  %v71_v15 = vadd.f32 1.0, %v325_v12  ;;  %v74_v25 = vmul.f32 -0.5, %v325_v12  ;;  %v77_v42 = vand.u32 2147483647, %v325_v12 }
  0xf1   :  { %v243_v17 = vadd.f32 1.0, %v327_v14  ;;  %v246_v29 = vmul.f32 -0.5, %v327_v14  ;;  %v230_v40 = vmul.f32 %v323_v9, %v229_v28  ;;  %v249_v45 = vand.u32 2147483647, %v327_v14 }
  0xf2   :  { %334 = vlog2.f32 %v71_v15  ;;  %v75_v38 = vadd.f32 1.0, %v74_v25  ;;  %vm78_vm8 = vcmp.lt.f32.partialorder %v77_v42, 0.0004427343 }
  0xf3   :  { %336 = vlog2.f32 %v243_v17  ;;  %v247_v41 = vadd.f32 1.0, %v246_v29  ;;  %vm250_vm9 = vcmp.lt.f32.partialorder %v249_v45, 0.0004427343 }
  0xf4   :  { %v76_v56 = vmul.f32 %v325_v12, %v75_v38 }
  0xf5   :  { %v329_v21 = vpop.eup %328  ;;  %v248_v58 = vmul.f32 %v327_v14, %v247_v41 }
  0xf6   :  { %v218_v23 = vmul.f32 0.6931472, %v329_v21  ;;  %v331_v26 = vpop.eup %330 }
  0xf7   :  { %v236_v31 = vmul.f32 0.6931472, %v331_v26 }
  0xf8   :  { %v224_v30 = vsel %vm223_vm1, %v221_v24, %v218_v23 }
  0xf9   :  { %v333_v34 = vpop.eup %332  ;;  %v252_v35 = vadd.f32 %v224_v30, %v188_v27  ;;  %v242_v37 = vsel %vm241_vm3, %v239_v32, %v236_v31 }
  0xfa   :  { %v227_v39 = vmul.f32 0.6931472, %v333_v34  ;;  %v254_v43 = vadd.f32 %v242_v37, %v190_v36 }
  0xfb   :  { %v256_v52 = vsel %vm192_vm2, %v500_v48, %v252_v35 }
  0xfc   :  { %v335_v46 = vpop.eup %334  ;;  %v233_v47 = vsel %vm232_vm5, %v230_v40, %v227_v39  ;;  %v258_v0 = vsel %vm194_vm6, %v503_v50, %v254_v43  ;;  %v271_v48 = vsel %vm260_vm4, %v256_v52, 0.0 }
  0xfd   :  { %v337_v51 = vpop.eup %336  ;;  %v253_v54 = vadd.f32 %v233_v47, %v189_v44  ;;  %v73_v55 = vmul.f32 0.6931472, %v335_v46  ;;  %v274_v6 = vsel %vm260_vm4, %v258_v0, 0.0 }
  0xfe   :  { %v245_v57 = vmul.f32 0.6931472, %v337_v51 }
  0xff   :  { %v257_v62 = vsel %vm193_vm7, %v506_v53, %v253_v54  ;;  %v79_v63 = vsel %vm78_vm8, %v76_v56, %v73_v55 }
 0x100   :  { %v251_v1 = vsel %vm250_vm9, %v248_v58, %v245_v57  ;;  %v80_v2 = vadd.f32 %v79_v63, %v64_v60  ;;  %v272_v3 = vsel %vm260_vm4, %v257_v62, 0.0 }
 0x101   :  { %v255_v4 = vadd.f32 %v251_v1, %v191_v49  ;;  %v273_v5 = vadd.f32 %v272_v3, %v271_v48 }
 0x102   :  { %v81_v53 = vsel %vm65_vm10, %v509_v59, %v80_v2 }
 0x103   :  { %v261_v50 = vsel %vm260_vm4, %v81_v53, 0.0  ;;  %v259_v7 = vsel %vm195_vm11, %v511_v61, %v255_v4  ;;  %v275_v8 = vadd.f32 %v274_v6, %v273_v5 }
 0x104   :  { %262 = vadd.xlane.f32.xlu1 %v261_v50  ;;  %v276_v9 = vsel %vm260_vm4, %v259_v7, 0.0 }
 0x105   :  { %v277_v10 = vadd.f32 %v276_v9, %v275_v8 }
 0x107   :  { %278 = vadd.xlane.f32.xlu0 %v277_v10 }
 0x191   :  { %v263_v11 = vpop.xlane.xlu1 %262 }
 0x192   :  { %v264_v12 = vrot.slane %v263_v11, 4 }
 0x194   :  { %v265_v13 = vadd.f32 %v264_v12, %v263_v11  ;;  %v279_v14 = vpop.xlane.xlu0 %278 }
 0x195   :  { %v280_v59 = vrot.slane %v279_v14, 4 }
 0x196   :  { %v266_v15 = vrot.slane %v265_v13, 2 }
 0x197   :  { %v281_v16 = vadd.f32 %v280_v59, %v279_v14 }
 0x198   :  { %v267_v17 = vadd.f32 %v266_v15, %v265_v13 }
 0x199   :  { %v282_v18 = vrot.slane %v281_v16, 2 }
 0x19a   :  { %v268_v19 = vrot.slane %v267_v17, 1 }
 0x19b   :  { %v283_v20 = vadd.f32 %v282_v18, %v281_v16 }
 0x19c   :  { %v269_v21 = vadd.f32 %v268_v19, %v267_v17 }
 0x19d   :  { %v284_v22 = vrot.slane %v283_v20, 1 }
 0x19e   :  { %306 = vpush %v269_v21 }
 0x19f   :  { %v285_v61 = vadd.f32 %v284_v22, %v283_v20 }
 0x1a1   :  { %308 = vpush %v285_v61 }
 0x1cf   :  { %s307_s2 = spop %306 }
 0x1d2   :  { %s309_s23 = spop %308 }
 0x1d3   :  { %s287_s24 = sadd.f32 %s309_s23, %s307_s2 }
 0x1d5   :  { %v288_v23 = vstv %s287_s24 }
 0x1d6   :  { %289 = vst [vmem:[#allocation8] sm:$0xff] %v288_v23 }
 0x1d7   :  { %415 = shalt.err (!%p412_p0)
}
 0x1d8   :  { %s416_s28 = scalar_lea.hbm %s561_s3, 128 }
 0x1d9   :  { %p417_p1 = scmp.ne.s32.totalorder %s561_s3, %s416_s28  ;;  %p420_p2 = scmp.lt.u32.totalorder %s416_s28, %s561_s3 }
 0x1db   :  { %p422_p3 = pnand %p420_p2, %p417_p1 }
 0x1dd   :  { %425 = shalt.err (!%p422_p3)
}
 0x1de   :  { %299 = dma.vmem_to_hbm [thread:$0]  %s297_s22, 128, %s561_s3, [#allocation4]  }
 0x1df   :  { %430 = dma.done.wait [#allocation4], 128  }
 0x1e0   :  { %431 = vsyncadd [#allocation4], 4294967168 }
 0x1e1   :  { %303 = vsyncpa [#allocation3], 1 }
 0x1e2   :  { %304 = vsyncpa [#allocation6], 1 }
 0x1e3   :  { %305 = vsyncpa [#allocation4], 1 }

</bundles_post_ra>
